<compile_context>
chip_gen: v5e
topology: v5e:2x2
jax: 0.10.0
libtpu: 0.0.40
codegen_flags: <defaults>
</compile_context>

<pallas_src>
import functools
import math

import jax
import jax.numpy as jnp
from jax import lax
from jax.experimental import pallas as pl
from jax.experimental.pallas import tpu as pltpu


def _self_attention_kernel(x_ref, we_ref, be_ref, wq_ref, bq_ref, wk_ref, bk_ref,
                           att_ref, emb_ref,
                           emb_sc, k_sc, *,
                           inv_scale, mask, multi_head, num_heads, d_model,
                           tq, seq_len, att_dtype):
    """One grid step == (batch element b, query tile qi)."""
    qi = pl.program_id(1)

    # ---- once per batch element: embed the full sequence + project keys -----
    @pl.when(qi == 0)
    def _():
        x = x_ref[0]                                               # (T, in_dims)
        emb = jnp.dot(x, we_ref[...],
                      preferred_element_type=jnp.float32) + be_ref[...]
        emb_sc[...] = emb                                          # f32 cache
        k = jnp.dot(emb, wk_ref[...],
                    preferred_element_type=jnp.float32) + bk_ref[...]
        k_sc[...] = k.astype(jnp.bfloat16)                         # bf16 MXU operand

    # ---- per query tile ------------------------------------------------------
    q_start = pl.multiple_of(qi * tq, tq)
    emb_q = emb_sc[pl.ds(q_start, tq), :]                          # (TQ, D) f32
    emb_ref[0] = emb_q

    # scale folded into q in f32 BEFORE the bf16 cast (no (TQ,T) multiply later)
    q = (jnp.dot(emb_q, wq_ref[...],
                 preferred_element_type=jnp.float32) + bq_ref[...]) * inv_scale
    q_b = q.astype(jnp.bfloat16)                                   # (TQ, D)
    k_b = k_sc[...]                                                # (T, D) bf16

    if mask:
        row = q_start + lax.broadcasted_iota(jnp.int32, (tq, 1), 0)
        col = lax.broadcasted_iota(jnp.int32, (tq, seq_len), 1)
        causal = col <= row                                        # bool (TQ, T)

    def _softmax(s):
        m = jnp.max(s, axis=-1, keepdims=True)
        p = jnp.exp(s - m)
        return p * pl.reciprocal(jnp.sum(p, axis=-1, keepdims=True), approx=True)

    if multi_head:
        hd = d_model // num_heads
        # one-time layout transform per tile, then ONE batched matmul for all heads
        qh = jnp.stack([q_b[:, h * hd:(h + 1) * hd] for h in range(num_heads)], 0)
        kh = jnp.stack([k_b[:, h * hd:(h + 1) * hd] for h in range(num_heads)], 0)
        s = lax.dot_general(qh, kh, (((2,), (2,)), ((0,), (0,))),
                            preferred_element_type=jnp.float32)    # (H, TQ, T)
        a = _softmax(s)
        if mask:
            a = jnp.where(causal[None, :, :], a, 0.0)   # module masks AFTER softmax
        att_ref[0] = a.astype(att_dtype)
    else:
        s = lax.dot_general(q_b, k_b, (((1,), (1,)), ((), ())),
                            preferred_element_type=jnp.float32)    # (TQ, T)
        a = _softmax(s)
        if mask:
            a = jnp.where(causal, a, 0.0)                # module masks AFTER softmax
        att_ref[0] = a.astype(att_dtype)


def _vmem_limit_bytes():
    """~75% of this generation's per-core VMEM (v5e/v6e 128 MiB, v7x 64 MiB),
    capped at 100 MiB.  Falls back to a v7x-safe 48 MiB if the query fails."""
    cap = 64 * 1024 * 1024
    try:
        cap = int(pltpu.get_tpu_info().vmem_capacity_bytes)
    except Exception:
        pass
    return min((cap * 3) // 4, 100 * 1024 * 1024)


def _pick_query_tile(seq_len, d_model, in_dims, h_eff, mask, att_dtype,
                     vmem_limit_bytes):
    """Largest TQ (multiple of 8 dividing T, capped at 1024) whose residents fit
    the SAME budget passed to vmem_limit_bytes.  Accounts for num_heads, the
    double-buffered attention output, score/prob temporaries and mask iotas."""
    att_bytes = jnp.dtype(att_dtype).itemsize
    # Resident bytes that do not scale with TQ.
    fixed = (2 * seq_len * in_dims * 4          # x full-seq block (double-buffered)
             + seq_len * d_model * 4            # emb cache (f32 scratch)
             + seq_len * d_model * 2            # key cache (bf16 scratch)
             + 4 * d_model * d_model * 4)       # weights/biases (generous)
    # Bytes per query row.
    per_tq = ((2 * att_bytes + 3 * 4) * h_eff * seq_len   # att out x2 + s/p/where temps
              + ((4 + 1) * seq_len if mask else 0)        # int32 col iota + bool mask
              + 2 * d_model * 4                           # emb out tile x2
              + d_model * (4 + 2))                        # q f32 + q bf16
    budget = vmem_limit_bytes - fixed - (4 << 20)         # 4 MiB slack
    cap = int(min(max(8, budget // per_tq), 1024, seq_len))
    if seq_len <= cap:
        return seq_len
    for tqs in range(cap - cap % 8, 7, -8):
        if seq_len % tqs == 0:
            return tqs
    return seq_len  # fallback: whole sequence in one block


def self_attention(x, params, *, mask=False, multi_head=False, num_heads=4,
                   att_dtype=jnp.float32):
    """Pallas implementation of SelfAttention.forward.

    x: (B, T, in_dims) float32
    params: we (in_dims, D), be (1, D), wq (D, D), bq (1, D), wk (D, D), bk (1, D)
            (weights stored pre-transposed so the kernel does x @ W + b)
    att_dtype: dtype of the attention output (f32 == module semantics; bf16
               halves the HBM writeback of the (B,[H,]T,T) matrix).
    Returns (attention, embeddings).
    """
    B, T, in_dims = x.shape
    d_model = params['wq'].shape[0]
    inv_scale = 1.0 / math.sqrt(float(d_model))

    h_eff = num_heads if multi_head else 1
    vmem_limit = _vmem_limit_bytes()
    tq = _pick_query_tile(T, d_model, in_dims, h_eff, mask, att_dtype, vmem_limit)
    nq = T // tq

    if multi_head:
        att_shape = (B, num_heads, T, T)
        att_block = (1, num_heads, tq, T)
        att_map = lambda b, qi: (b, 0, qi, 0)
    else:
        att_shape = (B, T, T)
        att_block = (1, tq, T)
        att_map = lambda b, qi: (b, qi, 0)

    kernel = functools.partial(
        _self_attention_kernel,
        inv_scale=inv_scale, mask=mask, multi_head=multi_head,
        num_heads=num_heads, d_model=d_model, tq=tq, seq_len=T,
        att_dtype=att_dtype)

    grid_spec = pltpu.PrefetchScalarGridSpec(
        num_scalar_prefetch=0,
        grid=(B, nq),
        in_specs=[
            # full sequence x (resident across qi: constant index_map in qi)
            pl.BlockSpec((1, T, in_dims), lambda b, qi: (b, 0, 0)),
            # grid-invariant weights (stay resident)
            pl.BlockSpec((in_dims, d_model), lambda b, qi: (0, 0)),     # we
            pl.BlockSpec((1, d_model), lambda b, qi: (0, 0)),           # be
            pl.BlockSpec((d_model, d_model), lambda b, qi: (0, 0)),     # wq
            pl.BlockSpec((1, d_model), lambda b, qi: (0, 0)),           # bq
            pl.BlockSpec((d_model, d_model), lambda b, qi: (0, 0)),     # wk
            pl.BlockSpec((1, d_model), lambda b, qi: (0, 0)),           # bk
        ],
        out_specs=[
            pl.BlockSpec(att_block, att_map),                           # attention
            pl.BlockSpec((1, tq, d_model), lambda b, qi: (b, qi, 0)),   # embeddings
        ],
        scratch_shapes=[
            pltpu.VMEM((T, d_model), jnp.float32),     # emb cache (full sequence)
            pltpu.VMEM((T, d_model), jnp.bfloat16),    # key cache (bf16 MXU operand)
        ],
    )

    att, emb = pl.pallas_call(
        kernel,
        grid_spec=grid_spec,
        out_shape=(
            jax.ShapeDtypeStruct(att_shape, att_dtype),
            jax.ShapeDtypeStruct((B, T, d_model), jnp.float32),
        ),
        compiler_params=pltpu.CompilerParams(
            # qi must be sequential ("arbitrary") so the emb/key caches written at
            # qi == 0 stay valid; b stays "parallel" so megacore splits batches.
            dimension_semantics=("parallel", "arbitrary"),
            vmem_limit_bytes=vmem_limit),
    )(x, params['we'], params['be'], params['wq'], params['bq'],
      params['wk'], params['bk'])
    return att, emb


def _init_linear(key, fan_in, fan_out):
    # PyTorch nn.Linear default init: U(-1/sqrt(fan_in), 1/sqrt(fan_in)).
    kw, kb = jax.random.split(key)
    bound = 1.0 / math.sqrt(fan_in)
    w = jax.random.uniform(kw, (fan_in, fan_out), jnp.float32, -bound, bound)
    b = jax.random.uniform(kb, (1, fan_out), jnp.float32, -bound, bound)
    return w, b


def _reference(x, params, scale, *, mask=False, multi_head=False, num_heads=4):
    """Plain-JAX reference.  Mirrors the kernel numerics: scale folded into q in
    f32, q/k rounded to bf16 before the score matmul (f32 accumulation)."""
    emb = x @ params['we'] + params['be']
    q = emb @ params['wq'] + params['bq']
    k = emb @ params['wk'] + params['bk']
    qb = (q * (1.0 / scale)).astype(jnp.bfloat16).astype(jnp.float32)
    kb = k.astype(jnp.bfloat16).astype(jnp.float32)
    if multi_head:
        B, T, D = q.shape
        hd = D // num_heads
        qh = qb.reshape(B, T, num_heads, hd).transpose(0, 2, 1, 3)
        kh = kb.reshape(B, T, num_heads, hd).transpose(0, 2, 1, 3)
        scores = jnp.einsum('bhtd,bhsd->bhts', qh, kh)
    else:
        scores = jnp.einsum('btd,bsd->bts', qb, kb)
    att = jax.nn.softmax(scores, axis=-1)
    if mask:
        T = att.shape[-1]
        att = att * jnp.tril(jnp.ones((T, T), jnp.float32))
    return att, emb


if __name__ == "__main__":
    B, T, in_dims, d_model, num_heads = 2, 8, 2, 64, 4

    key = jax.random.PRNGKey(0)
    k_x, k_e, k_q, k_k = jax.random.split(key, 4)

    x = jax.random.normal(k_x, (B, T, in_dims), jnp.float32)
    we, be = _init_linear(k_e, in_dims, d_model)
    wq, bq = _init_linear(k_q, d_model, d_model)
    wk, bk = _init_linear(k_k, d_model, d_model)
    params = dict(we=we, be=be, wq=wq, bq=bq, wk=wk, bk=bk)
    scale = math.sqrt(float(d_model))

    # default forward path: mask=False, multi_head=False
    att, emb = self_attention(x, params)
    jax.block_until_ready((att, emb))
    att_r, emb_r = _reference(x, params, scale)
    assert emb.shape == (B, T, d_model) and att.shape == (B, T, T)
    assert jnp.allclose(emb, emb_r, atol=1e-5, rtol=1e-5), "embedding mismatch"
    # tolerance loosened for bf16 MXU operands + approx reciprocal softmax denom
    assert jnp.allclose(att, att_r, atol=5e-3, rtol=5e-3), "attention mismatch"

    # masked path (module multiplies probabilities by tril AFTER softmax)
    att_m, _ = self_attention(x, params, mask=True)
    att_mr, _ = _reference(x, params, scale, mask=True)
    assert jnp.allclose(att_m, att_mr, atol=5e-3, rtol=5e-3), "masked attention mismatch"

    # multi-head path (scale stays sqrt(d_model), matching the module)
    att_h, emb_h = self_attention(x, params, multi_head=True, num_heads=num_heads)
    jax.block_until_ready((att_h, emb_h))
    att_hr, emb_hr = _reference(x, params, scale, multi_head=True,
                                num_heads=num_heads)
    assert att_h.shape == (B, num_heads, T, T)
    assert jnp.allclose(emb_h, emb_hr, atol=1e-5, rtol=1e-5), "mh embedding mismatch"
    assert jnp.allclose(att_h, att_hr, atol=5e-3, rtol=5e-3), "mh attention mismatch"

    # optional bf16 attention output (halves HBM writeback) — smoke test only,
    # since it intentionally changes the output dtype vs the PyTorch module.
    att_b, _ = self_attention(x, params, att_dtype=jnp.bfloat16)
    jax.block_until_ready(att_b)
    assert att_b.dtype == jnp.bfloat16 and att_b.shape == (B, T, T)

    print("KERNEL_OK")
</pallas_src>

<mosaic_0001>
module attributes {stable_mosaic.version = 11 : i64} {
  func.func @_self_attention_kernel(%arg0: i32, %arg1: i32, %arg2: memref<1x8x2xf32, #tpu.memory_space<vmem>>, %arg3: memref<2x64xf32, #tpu.memory_space<vmem>>, %arg4: memref<1x64xf32, #tpu.memory_space<vmem>>, %arg5: memref<64x64xf32, #tpu.memory_space<vmem>>, %arg6: memref<1x64xf32, #tpu.memory_space<vmem>>, %arg7: memref<64x64xf32, #tpu.memory_space<vmem>>, %arg8: memref<1x64xf32, #tpu.memory_space<vmem>>, %arg9: memref<1x8x8xf32, #tpu.memory_space<vmem>>, %arg10: memref<1x8x64xf32, #tpu.memory_space<vmem>>, %arg11: memref<8x64xf32, #tpu.memory_space<vmem>>, %arg12: memref<8x64xbf16, #tpu.memory_space<vmem>>) attributes {dimension_semantics = [#tpu.dimension_semantics<parallel>, #tpu.dimension_semantics<arbitrary>], iteration_bounds = array<i64: 2, 1>, scalar_prefetch = 0 : i64, scratch_operands = 2 : i64, tpu.core_type = #tpu.core_type<tc>, window_params = [{transform_indices = @transform_0, window_bounds = array<i64: 1, 8, 2>}, {pipeline_mode = #tpu.pipeline_mode<synchronous>, transform_indices = @transform_1, window_bounds = array<i64: 2, 64>}, {pipeline_mode = #tpu.pipeline_mode<synchronous>, transform_indices = @transform_2, window_bounds = array<i64: 1, 64>}, {pipeline_mode = #tpu.pipeline_mode<synchronous>, transform_indices = @transform_3, window_bounds = array<i64: 64, 64>}, {pipeline_mode = #tpu.pipeline_mode<synchronous>, transform_indices = @transform_4, window_bounds = array<i64: 1, 64>}, {pipeline_mode = #tpu.pipeline_mode<synchronous>, transform_indices = @transform_5, window_bounds = array<i64: 64, 64>}, {pipeline_mode = #tpu.pipeline_mode<synchronous>, transform_indices = @transform_6, window_bounds = array<i64: 1, 64>}, {transform_indices = @transform_7, window_bounds = array<i64: 1, 8, 8>}, {transform_indices = @transform_8, window_bounds = array<i64: 1, 8, 64>}]} {
    %c0_i32 = arith.constant 0 : i32
    %0 = arith.cmpi eq, %arg1, %c0_i32 : i32
    %1 = arith.extui %0 : i1 to i32
    %c0_i32_0 = arith.constant 0 : i32
    %2 = arith.cmpi ne, %1, %c0_i32_0 : i32
    scf.if %2 {
      %c0_17 = arith.constant 0 : index
      %c0_18 = arith.constant 0 : index
      %c0_19 = arith.constant 0 : index
      %33 = vector.load %arg2[%c0_17, %c0_18, %c0_19] : memref<1x8x2xf32, #tpu.memory_space<vmem>>, vector<1x8x2xf32>
      %34 = vector.shape_cast %33 : vector<1x8x2xf32> to vector<8x2xf32>
      %c0_20 = arith.constant 0 : index
      %c0_21 = arith.constant 0 : index
      %35 = vector.load %arg3[%c0_20, %c0_21] : memref<2x64xf32, #tpu.memory_space<vmem>>, vector<2x64xf32>
      %cst_22 = arith.constant dense<0.000000e+00> : vector<8x64xf32>
      %36 = tpu.matmul %34, %35, %cst_22 {dimension_numbers = #tpu.dot_dimension_numbers<[1], [0], [0], [1], [0, 0, 1, 1], [], []>} : vector<8x2xf32>, vector<2x64xf32>, vector<8x64xf32> -> vector<8x64xf32>
      %c0_23 = arith.constant 0 : index
      %c0_24 = arith.constant 0 : index
      %37 = vector.load %arg4[%c0_23, %c0_24] : memref<1x64xf32, #tpu.memory_space<vmem>>, vector<1x64xf32>
      %38 = vector.broadcast %37 : vector<1x64xf32> to vector<8x64xf32>
      %39 = arith.addf %36, %38 : vector<8x64xf32>
      %c0_25 = arith.constant 0 : index
      %c0_26 = arith.constant 0 : index
      %40 = vector.load %arg11[%c0_25, %c0_26] : memref<8x64xf32, #tpu.memory_space<vmem>>, vector<8x64xf32>
      tpu.vector_store %arg11[%c0_25, %c0_26], %39 {strides = array<i32>} : memref<8x64xf32, #tpu.memory_space<vmem>>, vector<8x64xf32>,
      %c0_27 = arith.constant 0 : index
      %c0_28 = arith.constant 0 : index
      %41 = vector.load %arg7[%c0_27, %c0_28] : memref<64x64xf32, #tpu.memory_space<vmem>>, vector<64x64xf32>
      %cst_29 = arith.constant dense<0.000000e+00> : vector<8x64xf32>
      %42 = tpu.matmul %39, %41, %cst_29 {dimension_numbers = #tpu.dot_dimension_numbers<[1], [0], [0], [1], [0, 0, 1, 1], [], []>} : vector<8x64xf32>, vector<64x64xf32>, vector<8x64xf32> -> vector<8x64xf32>
      %c0_30 = arith.constant 0 : index
      %c0_31 = arith.constant 0 : index
      %43 = vector.load %arg8[%c0_30, %c0_31] : memref<1x64xf32, #tpu.memory_space<vmem>>, vector<1x64xf32>
      %44 = vector.broadcast %43 : vector<1x64xf32> to vector<8x64xf32>
      %45 = arith.addf %42, %44 : vector<8x64xf32>
      %46 = arith.truncf %45 : vector<8x64xf32> to vector<8x64xbf16>
      %c0_32 = arith.constant 0 : index
      %c0_33 = arith.constant 0 : index
      %47 = vector.load %arg12[%c0_32, %c0_33] : memref<8x64xbf16, #tpu.memory_space<vmem>>, vector<8x64xbf16>
      tpu.vector_store %arg12[%c0_32, %c0_33], %46 {strides = array<i32>} : memref<8x64xbf16, #tpu.memory_space<vmem>>, vector<8x64xbf16>,
    } else {
    }
    %c8_i32 = arith.constant 8 : i32
    %3 = arith.muli %arg1, %c8_i32 : i32
    %4 = tpu.assume_multiple %3, 8 : i32
    %5 = arith.index_cast %4 : i32 to index
    %c0 = arith.constant 0 : index
    %6 = vector.load %arg11[%5, %c0] : memref<8x64xf32, #tpu.memory_space<vmem>>, vector<8x64xf32>
    %c0_1 = arith.constant 0 : index
    %c0_2 = arith.constant 0 : index
    %c0_3 = arith.constant 0 : index
    %7 = vector.load %arg10[%c0_1, %c0_2, %c0_3] : memref<1x8x64xf32, #tpu.memory_space<vmem>>, vector<1x8x64xf32>
    %8 = vector.shape_cast %7 : vector<1x8x64xf32> to vector<8x64xf32>
    %9 = vector.shape_cast %6 : vector<8x64xf32> to vector<1x8x64xf32>
    tpu.vector_store %arg10[%c0_1, %c0_2, %c0_3], %9 {strides = array<i32>} : memref<1x8x64xf32, #tpu.memory_space<vmem>>, vector<1x8x64xf32>,
    %c0_4 = arith.constant 0 : index
    %c0_5 = arith.constant 0 : index
    %10 = vector.load %arg5[%c0_4, %c0_5] : memref<64x64xf32, #tpu.memory_space<vmem>>, vector<64x64xf32>
    %cst = arith.constant dense<0.000000e+00> : vector<8x64xf32>
    %11 = tpu.matmul %6, %10, %cst {dimension_numbers = #tpu.dot_dimension_numbers<[1], [0], [0], [1], [0, 0, 1, 1], [], []>} : vector<8x64xf32>, vector<64x64xf32>, vector<8x64xf32> -> vector<8x64xf32>
    %c0_6 = arith.constant 0 : index
    %c0_7 = arith.constant 0 : index
    %12 = vector.load %arg6[%c0_6, %c0_7] : memref<1x64xf32, #tpu.memory_space<vmem>>, vector<1x64xf32>
    %13 = vector.broadcast %12 : vector<1x64xf32> to vector<8x64xf32>
    %14 = arith.addf %11, %13 : vector<8x64xf32>
    %cst_8 = arith.constant 1.250000e-01 : f32
    %15 = vector.broadcast %cst_8 : f32 to vector<8x64xf32>
    %16 = arith.mulf %14, %15 : vector<8x64xf32>
    %17 = arith.truncf %16 : vector<8x64xf32> to vector<8x64xbf16>
    %c0_9 = arith.constant 0 : index
    %c0_10 = arith.constant 0 : index
    %18 = vector.load %arg12[%c0_9, %c0_10] : memref<8x64xbf16, #tpu.memory_space<vmem>>, vector<8x64xbf16>
    %cst_11 = arith.constant dense<0.000000e+00> : vector<8x8xf32>
    %19 = tpu.matmul %17, %18, %cst_11 {dimension_numbers = #tpu.dot_dimension_numbers<[1], [1], [0], [0], [0, 0, 1, 0], [], []>} : vector<8x64xbf16>, vector<8x64xbf16>, vector<8x8xf32> -> vector<8x8xf32>
    %cst_12 = arith.constant dense<0xFF800000> : vector<8xf32>
    %20 = vector.multi_reduction <maximumf>, %19, %cst_12 [1] : vector<8x8xf32> to vector<8xf32>
    %21 = vector.shape_cast %20 : vector<8xf32> to vector<8x1xf32>
    %22 = vector.broadcast %21 : vector<8x1xf32> to vector<8x8xf32>
    %23 = arith.subf %19, %22 : vector<8x8xf32>
    %24 = math.exp %23 : vector<8x8xf32>
    %cst_13 = arith.constant dense<0.000000e+00> : vector<8xf32>
    %25 = vector.multi_reduction <add>, %24, %cst_13 [1] : vector<8x8xf32> to vector<8xf32>
    %26 = vector.shape_cast %25 : vector<8xf32> to vector<8x1xf32>
    %27 = tpu.reciprocal %26 {approx = true} : vector<8x1xf32> -> vector<8x1xf32>
    %28 = vector.broadcast %27 : vector<8x1xf32> to vector<8x8xf32>
    %29 = arith.mulf %24, %28 : vector<8x8xf32>
    %c0_14 = arith.constant 0 : index
    %c0_15 = arith.constant 0 : index
    %c0_16 = arith.constant 0 : index
    %30 = vector.load %arg9[%c0_14, %c0_15, %c0_16] : memref<1x8x8xf32, #tpu.memory_space<vmem>>, vector<1x8x8xf32>
    %31 = vector.shape_cast %30 : vector<1x8x8xf32> to vector<8x8xf32>
    %32 = vector.shape_cast %29 : vector<8x8xf32> to vector<1x8x8xf32>
    tpu.vector_store %arg9[%c0_14, %c0_15, %c0_16], %32 {strides = array<i32>} : memref<1x8x8xf32, #tpu.memory_space<vmem>>, vector<1x8x8xf32>,
    return
  }
  func.func @transform_0(%arg0: i32, %arg1: i32) -> (i32, i32, i32) {
    %c0_i32 = arith.constant 0 : i32
    %c0_i32_0 = arith.constant 0 : i32
    %c0_i32_1 = arith.constant 0 : i32
    return %arg0, %c0_i32, %c0_i32_0 : i32, i32, i32
  }
  func.func @transform_1(%arg0: i32, %arg1: i32) -> (i32, i32) {
    %c0_i32 = arith.constant 0 : i32
    %c0_i32_0 = arith.constant 0 : i32
    %c0_i32_1 = arith.constant 0 : i32
    return %c0_i32, %c0_i32_0 : i32, i32
  }
  func.func @transform_2(%arg0: i32, %arg1: i32) -> (i32, i32) {
    %c0_i32 = arith.constant 0 : i32
    %c0_i32_0 = arith.constant 0 : i32
    %c0_i32_1 = arith.constant 0 : i32
    return %c0_i32, %c0_i32_0 : i32, i32
  }
  func.func @transform_3(%arg0: i32, %arg1: i32) -> (i32, i32) {
    %c0_i32 = arith.constant 0 : i32
    %c0_i32_0 = arith.constant 0 : i32
    %c0_i32_1 = arith.constant 0 : i32
    return %c0_i32, %c0_i32_0 : i32, i32
  }
  func.func @transform_4(%arg0: i32, %arg1: i32) -> (i32, i32) {
    %c0_i32 = arith.constant 0 : i32
    %c0_i32_0 = arith.constant 0 : i32
    %c0_i32_1 = arith.constant 0 : i32
    return %c0_i32, %c0_i32_0 : i32, i32
  }
  func.func @transform_5(%arg0: i32, %arg1: i32) -> (i32, i32) {
    %c0_i32 = arith.constant 0 : i32
    %c0_i32_0 = arith.constant 0 : i32
    %c0_i32_1 = arith.constant 0 : i32
    return %c0_i32, %c0_i32_0 : i32, i32
  }
  func.func @transform_6(%arg0: i32, %arg1: i32) -> (i32, i32) {
    %c0_i32 = arith.constant 0 : i32
    %c0_i32_0 = arith.constant 0 : i32
    %c0_i32_1 = arith.constant 0 : i32
    return %c0_i32, %c0_i32_0 : i32, i32
  }
  func.func @transform_7(%arg0: i32, %arg1: i32) -> (i32, i32, i32) {
    %c0_i32 = arith.constant 0 : i32
    %c0_i32_0 = arith.constant 0 : i32
    return %arg0, %arg1, %c0_i32 : i32, i32, i32
  }
  func.func @transform_8(%arg0: i32, %arg1: i32) -> (i32, i32, i32) {
    %c0_i32 = arith.constant 0 : i32
    %c0_i32_0 = arith.constant 0 : i32
    return %arg0, %arg1, %c0_i32 : i32, i32, i32
  }
}

</mosaic_0001>

<bundles_post_ra>
// kernel: tpu_custom_call.1
= control target key start
LH: loop header
LB: loop body
LE: loop exit
PB: predicated region body
PF: predicated region fallthrough
CT: control target
= control target key end

     0   :  { %s1193_s0 = inlined_call_operand.vmem [shape: f32[2,8,2], index: 0, kind: input, shape index: {}]   ;;  %s1194_s1 = inlined_call_operand.vmem [shape: f32[2,64], index: 1, kind: input, shape index: {}]   ;;  %s1195_s2 = inlined_call_operand.vmem [shape: f32[1,64], index: 2, kind: input, shape index: {}]   ;;  %s1196_s3 = inlined_call_operand.hbm [shape: f32[64,64], index: 3, kind: input, shape index: {}]   ;;  %s1197_s4 = inlined_call_operand.vmem [shape: f32[1,64], index: 4, kind: input, shape index: {}]   ;;  %s1198_s5 = inlined_call_operand.hbm [shape: f32[64,64], index: 5, kind: input, shape index: {}]   ;;  %s1199_s6 = inlined_call_operand.vmem [shape: f32[1,64], index: 6, kind: input, shape index: {}]   ;;  %s1200_s7 = inlined_call_operand.hbm [shape: f32[2,8,8], index: 7, kind: output, shape index: {0}]   ;;  %s1201_s8 = inlined_call_operand.hbm [shape: f32[2,8,64], index: 8, kind: output, shape index: {1}]  }
   0x1   :  { %1204 = sst [smem:[#allocation17_spill]] %s1193_s0 }
   0x2   :  { %14 = vsyncpa [#allocation5], 0 }
   0x3   :  { %15 = vsyncpa [#allocation8], 0 }
   0x4   :  { %16 = vsyncpa [#allocation6], 0 }
   0x5   :  { %18 = vsyncpa [#allocation6 + $0x1], 0 }
   0x6   :  { %19 = vsyncpa [#allocation11], 0 }
   0x7   :  { %21 = vsyncpa [#allocation11 + $0x1], 0  ;;  %s1021_s27 = smov 0   ;;  %s1023_s28 = smov 0  }
   0x8   :  { %s1025_s29 = smov 0   ;;  %s1027_s30 = smov 0  }
   0x9   :  { %s1029_s9 = smov 0   ;;  %s1031_s10 = smov 0  }
   0xa LB: > { %s679_s11 = sadd.s32 4294967295, %s970_s10   ;;  %s680_s12 = sadd.s32 4294967294, %s970_s10   ;;  %s970_s10 = sphi %s1031_s10, %s27_s10   ;;  %s966_s9 = sphi %s1029_s9, %s1217_s9   ;;  %s962_s30 = sphi %s1027_s30, %s1216_s30   ;;  %s958_s29 = sphi %s1025_s29, %s1215_s29   ;;  %s954_s28 = sphi %s1023_s28, %s1214_s28   ;;  %s950_s27 = sphi %s1021_s27, %s1213_s27  }
   0xb   : > { %s39_s13 = sadd.s32 1, %s966_s9  ;;  %s200_s14 = sadd.s32 1, %s958_s29 }
   0xc   : > { %p41_p0 = scmp.ge.s32.totalorder %s39_s13, 2  ;;  %p210_p1 = scmp.ne.s32.totalorder %s958_s29, %s954_s28 }
   0xd   : > { %p211_p2 = scmp.eq.s32.totalorder %s679_s11, 1  ;;  %p216_p3 = scmp.ne.s32.totalorder %s954_s28, %s950_s27 }
   0xe   : > { %s1219_s13 = smov (%p41_p0, %s39_s13), 0  ;;  %p217_p5 = scmp.eq.s32.totalorder %s680_s12, 1 }
   0xf   : > { %1205 = sst [smem:[#allocation16_spill]] %s1219_s13  ;;  %p1061_p4 = por %p211_p2, %p210_p1 }
  0x10   : > { %s195_s16 = ssub.s32 %s966_s9, %s1219_s13  ;;  %p681_p6 = scmp.ge.s32.totalorder %s970_s10, 1 }
  0x11   : > { %p198_p7 = scmp.eq.s32.totalorder %s195_s16, 0  ;;  %p1068_p8 = por %p217_p5, %p216_p3 }
  0x12   : > { %p252_p9 = scmp.lt.s32.totalorder %s970_s10, 3  ;;  %p1080_p11 = scmp.eq.s32.totalorder %s679_s11, 0 }
  0x13   : > { %s1074_s18 = scalar_select %p198_p7, %s958_s29, %s200_s14  }
  0x14   : > { %p1076_p10 = pnand %p681_p6, %p252_p9  ;;  %s269_s23 = sshll.u32 %s1196_s3, 4  ;;  %s270_s23 = int_to_ptr.hbm [resolvable:$true] %s269_s23 }
  0x15   : > { %s972_s24 = smov [#allocation4]   ;;  %s286_s11 = sshll.u32 %s1198_s5, 4  ;;  %s287_s11 = int_to_ptr.hbm [resolvable:$true] %s286_s11 }
  0x16   : > { %p714_p12 = pneg %p1076_p10  ;;  %s271_s25 = sshll.u32 %s972_s24, 4  ;;  %s272_s25 = int_to_ptr.vmem [resolvable:$true] %s271_s25 }
  0x17   : > { %s973_s14 = smov 128   ;;  %s974_s16 = smov 8  }
  0x18   : > { %p715_p13 = pnand %p1080_p11, %p714_p12  ;;  %s975_s13 = smov [#allocation7]  }
  0x19   : > { %s288_s21 = sshll.u32 %s975_s13, 4  ;;  %314 = sbr.rel (%p1076_p10) target bundleno = 704 (0x2c0), region = 48  ;;  %s289_s21 = int_to_ptr.vmem [resolvable:$true] %s288_s21 }
  0x1a   : > { %717 = dma.hbm_to_vmem [thread:$0]  (!%p715_p13), %s270_s23, 1024, %s272_s25, [#allocation5], %s973_s14, %s973_s14, %s974_s16  }
  0x1b   : > { %720 = dma.hbm_to_vmem [thread:$0]  (!%p715_p13), %s287_s11, 1024, %s289_s21, [#allocation8], %s973_s14, %s973_s14, %s974_s16  }
  0x1e   : > { %933 = dma.done.wait (%p1080_p11), [#allocation5], 1024  }
  0x1f   : > { %935 = vsyncadd (%p1080_p11), [#allocation5], 4294966272 }
  0x20   : > { %937 = dma.done.wait (%p1080_p11), [#allocation8], 1024  }
  0x21   : > { %939 = vsyncadd (%p1080_p11), [#allocation8], 4294966272  ;;  %p358_p0 = scmp.lt.s32.totalorder %s962_s30, 1  ;;  %vm377_vm0 = vcmask 1041408   ;;  %s1210_s0 = sld [smem:[#allocation17_spill]]  ;;  %vm373_vm1 = vcmask 15360  }
  0x22   : > { %v368_v0 = vld [vmem:[%s1194_s1] sm:$0x3]  ;;  %v410_v2 = vld [vmem:[#allocation7 + $0x38] sm:$0xff]  ;;  %v408_v4 = vld [vmem:[#allocation7 + $0x28] sm:$0xff]  ;;  %vm401_vm2 = vcmask 523264   ;;  %s1116_s11 = sand.u32 1, %s954_s28  }
  0x23   : > { %s359_s13 = scalar_select %p358_p0, %s962_s30, 1  ;;  %691 = vmatpush.msk.msra.mxu0 %vm377_vm0, %v368_v0  ;;  %426 = vmatpush.msra.mxu1 %v410_v2  ;;  %v409_v3 = vld [vmem:[#allocation7 + $0x30] sm:$0xff]  ;;  %v453_v5 = vld [vmem:[#allocation4 + $0x38] sm:$0xff]  ;;  %v407_v7 = vld [vmem:[#allocation7 + $0x20] sm:$0xff]  ;;  %vm439_vm3 = vcmask 519168   ;;  %vm503_vm4 = vcmask 64512  }
  0x24   : > { %469 = vmatpush.msra.mxu2 %v453_v5  ;;  %v452_v6 = vld [vmem:[#allocation4 + $0x30] sm:$0xff]  ;;  %v406_v8 = vld [vmem:[#allocation7 + $0x18] sm:$0xff]  ;;  %v404_v10 = vld [vmem:[#allocation7 + $0x8] sm:$0xff]  ;;  %s1203_s14 = sshll.u32 %s1116_s11, 3  ;;  %s698_s23 = sshll.u32 %s962_s30, 3 }
  0x25   : > { %s690_s22 = sshll.u32 %s359_s13, 3  ;;  %427 = vmatpush.msra.mxu1 %v409_v3  ;;  %v405_v9 = vld [vmem:[#allocation7 + $0x10] sm:$0xff]  ;;  %v451_v11 = vld [vmem:[#allocation4 + $0x28] sm:$0xff]  ;;  %v403_v12 = vld [vmem:[#allocation7] sm:$0xff]  ;;  %s1124_s16 = scalar_lea.vmem [#allocation10], %s1203_s14 }
  0x26   : > { %470 = vmatpush.msra.mxu2 %v452_v6  ;;  %v450_v13 = vld [vmem:[#allocation4 + $0x20] sm:$0xff]  ;;  %v449_v14 = vld [vmem:[#allocation4 + $0x18] sm:$0xff]  ;;  %v448_v15 = vld [vmem:[#allocation4 + $0x10] sm:$0xff]  ;;  %s548_s26 = scalar_lea.hbm %s1201_s8, %s698_s23  ;;  %s550_s20 = sshll.u32 %s1124_s16, 4  ;;  %s551_s20 = int_to_ptr.vmem [resolvable:$true] %s550_s20 }
  0x27   : > { %s361_s24 = scalar_lea.vmem %s1210_s0, %s690_s22  ;;  %428 = vmatpush.msra.mxu1 %v408_v4  ;;  %v447_v16 = vld [vmem:[#allocation4 + $0x8] sm:$0xff]  ;;  %v446_v17 = vld [vmem:[#allocation4] sm:$0xff]  ;;  %v785_v18 = vld [vmem:[%s1195_s2] ss:$0 sm:$0xff]  ;;  %s552_s12 = sshll.u32 %s548_s26, 4  ;;  %s553_s12 = int_to_ptr.hbm [resolvable:$true] %s552_s12 }
  0x28   : > { %v367_v1 = vld [vmem:[%s361_s24] sm:$0xff]  ;;  %471 = vmatpush.msra.mxu2 %v451_v11  ;;  %s522_s21 = scalar_lea.sflag [#allocation11], %s1116_s11  ;;  %s866_s13 = sshra.s32 %s553_s12, 4  ;;  %s867_s13 = int_to_ptr.hbm [resolvable:$true] %s866_s13 }
  0x29   : > { %692 = vmatmul.msk.f32.vlgmr.msra.gmra.mxu0 %vm373_vm1, %v367_v1  ;;  %429 = vmatpush.msra.mxu1 %v407_v7  ;;  %v786_v22 = vld [vmem:[%s1199_s6] ss:$0 sm:$0xff]  ;;  %s868_s22 = scalar_lea.hbm %s867_s13, 8  ;;  %s872_s14 = scalar_lea.hbm %s1201_s8, 16 }
  0x2a   : > { %472 = vmatpush.msra.mxu2 %v450_v13  ;;  %v787_v26 = vld [vmem:[%s1197_s4] ss:$0 sm:$0xff]  ;;  %p869_p1 = scmp.ne.s32.totalorder %s867_s13, %s868_s22  ;;  %p873_p5 = scmp.lt.s32.totalorder %s867_s13, %s1201_s8 }
  0x2b   : > { %430 = vmatpush.msra.mxu1 %v406_v8  ;;  %p874_p6 = scmp.lt.s32.totalorder %s872_s14, %s868_s22 }
  0x2c   : > { %473 = vmatpush.msra.mxu2 %v449_v14  ;;  %p870_p2 = pnand %p869_p1, %p1061_p4 }
  0x2d   : > { %431 = vmatpush.msra.mxu1 %v405_v9  ;;  %p875_p7 = por %p874_p6, %p873_p5 }
  0x2e   : > { %474 = vmatpush.msra.mxu2 %v448_v15  ;;  %p871_p3 = pneg %p870_p2 }
  0x2f   : > { %432 = vmatpush.msra.mxu1 %v404_v10 }
  0x30   : > { %475 = vmatpush.msra.mxu2 %v447_v16  ;;  %p876_p9 = pnand %p875_p7, %p871_p3 }
  0x31   : > { %433 = vmatpush.msra.mxu1 %v403_v12 }
  0x32   : > { %476 = vmatpush.msra.mxu2 %v446_v17 }
  0xa6   : > { %v398_v19 = vpop.f32.mrf.mxu0 }
  0xa7   : > { %v399_v20 = vadd.f32 %v785_v18, %v398_v19 }
  0xa9   : > { %402 = vst.msk [vmem:[#allocation2] sm:$0xff] %vm401_vm2, %v399_v20  ;;  %693 = vmatmul.msk.f32.vlgmr.msra.gmra.mxu1 %vm401_vm2, %v399_v20 }
  0xb0   : > { %v443_v21 = vld [vmem:[#allocation2] sm:$0xff] }
  0xb1   : > { %694 = vmatmul.msk.f32.vlgmr.msra.gmra.mxu2 %vm401_vm2, %v443_v21  ;;  %445 = vst.msk [vmem:[%s1124_s16] sm:$0xff] %vm401_vm2, %v443_v21 }
 0x126   : > { %v435_v23 = vpop.f32.mrf.mxu1 }
 0x127   : > { %v436_v24 = vadd.f32 %v786_v22, %v435_v23 }
 0x129   : > { %v438_v25 = vpack.c.bf16 %v436_v24, %v436_v24 }
 0x12b   : > { %440 = vst.msk [vmem:[#allocation3] sm:$0xf] %vm439_vm3, %v438_v25 }
 0x132   : > { %v483_v27 = vld [vmem:[#allocation3] sm:$0xf] }
 0x133   : > { %v488_v28 = vsel %vm401_vm2, %v483_v27, 0 }
 0x134   : > { %v478_v29 = vpop.f32.mrf.mxu2  ;;  %497 = vmatpush.bf16.xpose.msra.mxu3 %v488_v28 }
 0x135   : > { %v479_v30 = vadd.f32 %v787_v26, %v478_v29 }
 0x137   : > { %v481_v31 = vmul.f32 0.125, %v479_v30 }
 0x139   : > { %v482_v32 = vpack.c.bf16 %v481_v31, %v481_v31 }
 0x13b   : > { %695 = vmatmul.msk.bf16.vlgmr.msra.gmra.mxu3 %vm401_vm2, %v482_v32 }
 0x1be   : > { %v499_v33 = vpop.f32.mrf.mxu3 }
 0x1bf   : > { %v504_v34 = vsel %vm503_vm4, %v499_v33, -inf }
 0x1c0   : > { %505 = vmax.xlane.f32.xlu0 %v504_v34 }
 0x1c6   : > { %v501_v35 = vpop.f32.mrf.mxu3 }
 0x233   : > { %v506_v36 = vpop.xlane.xlu0 %505 }
 0x234   : > { %v507_v37 = vsub.f32 %v499_v33, %v506_v36 }
 0x236   : > { %v508_v38 = vmul.f32 1.442695, %v507_v37 }
 0x238   : > { %788 = vpow2.f32 %v508_v38 }
 0x23e   : > { %v789_v39 = vpop.eup %788 }
 0x23f   : > { %v510_v40 = vsel %vm503_vm4, %v789_v39, 0.0 }
 0x240   : > { %511 = vadd.xlane.f32.xlu0 %v510_v40 }
 0x241   : > { %879 = shalt.err (!%p876_p9)
}
 0x242   : > { %711 = dma.vmem_to_hbm [thread:$0]  (%p1061_p4), %s551_s20, 128, %s553_s12, %s522_s21  }
 0x243   : > { %s533_s26 = scalar_lea.hbm %s1200_s7, %s698_s23  ;;  %s1211_s30 = sshll.u32 %s1116_s11, 3 }
 0x244   : > { %s350_s19 = scalar_lea.vmem [#allocation9], %s1211_s30  ;;  %s537_s13 = sshll.u32 %s533_s26, 4  ;;  %s538_s13 = int_to_ptr.hbm [resolvable:$true] %s537_s13 }
 0x245   : > { %s535_s0 = sshll.u32 %s350_s19, 4  ;;  %s517_s14 = scalar_lea.sflag [#allocation6], %s1116_s11  ;;  %s536_s0 = int_to_ptr.vmem [resolvable:$true] %s535_s0 }
 0x246   : > { %s894_s22 = sshra.s32 %s538_s13, 4  ;;  %s900_s21 = scalar_lea.hbm %s1200_s7, 16  ;;  %s895_s22 = int_to_ptr.hbm [resolvable:$true] %s894_s22 }
 0x247   : > { %s896_s20 = scalar_lea.hbm %s895_s22, 8  ;;  %p901_p13 = scmp.lt.s32.totalorder %s895_s22, %s1200_s7 }
 0x248   : > { %p897_p10 = scmp.ne.s32.totalorder %s895_s22, %s896_s20  ;;  %p902_p0 = scmp.lt.s32.totalorder %s900_s21, %s896_s20 }
 0x24a   : > { %p898_p11 = pnand %p897_p10, %p1061_p4  ;;  %p903_p1 = por %p902_p0, %p901_p13 }
 0x24c   : > { %p899_p12 = pneg %p898_p11 }
 0x24e   : > { %p904_p2 = pnand %p903_p1, %p899_p12 }
 0x2b3   : > { %v512_v41 = vpop.xlane.xlu0 %511 }
 0x2b4   : > { %790 = vrcp.f32 %v512_v41 }
 0x2ba   : > { %v791_v42 = vpop.eup %790 }
 0x2bb   : > { %v514_v43 = vmul.f32 %v791_v42, %v789_v39 }
 0x2bd   : > { %515 = vst.msk [vmem:[%s350_s19] sm:$0xff] %vm503_vm4, %v514_v43 }
 0x2be   : > { %907 = shalt.err (!%p904_p2)
}
 0x2bf   : > { %710 = dma.vmem_to_hbm [thread:$0]  (%p1061_p4), %s536_s0, 128, %s538_s13, %s517_s14  }
 0x2c0 PF: > { %p732_p3 = scmp.ge.s32.totalorder %s970_s10, 2  ;;  %s564_s11 = sand.u32 1, %s950_s27  }
 0x2c1   : > { %s565_s25 = scalar_lea.sflag [#allocation6], %s564_s11 }
 0x2c2   : > { %p722_p5 = pnand %p732_p3, %p1068_p8 }
 0x2c4   : > { %p723_p6 = pneg %p722_p5 }
 0x2c6   : > { %941 = dma.done.wait (%p723_p6), %s565_s25, 128  }
 0x2c7   : > { %943 = vsyncadd (%p723_p6), %s565_s25, 4294967168  ;;  %s575_s26 = scalar_lea.sflag [#allocation11], %s564_s11 }
 0x2c8   : > { %945 = dma.done.wait (%p723_p6), %s575_s26, 128  }
 0x2c9   : > { %947 = vsyncadd (%p723_p6), %s575_s26, 4294967168  ;;  %s27_s10 = sadd.s32 1, %s970_s10   ;;  %s1212_s15 = sld [smem:[#allocation16_spill]] }
 0x2ca   : > { %p24_p7 = scmp.ge.s32.totalorder %s27_s10, 4   ;;  %s1213_s27 = smov %s954_s28 }
 0x2cb   : > { %s1214_s28 = smov %s958_s29  ;;  %s1215_s29 = smov %s1074_s18 }
 0x2cc   : > { %s1216_s30 = smov %s966_s9  ;;  %26 = sbr.rel (!%p24_p7) target bundleno = 10 (0xa), region = 114 }
 0x2cf   : > { %s1217_s9 = smov %s1212_s15 }
 0x2d1   :  { %581 = vsyncpa [#allocation5], 1 }
 0x2d2   :  { %583 = vsyncpa [#allocation5 + $0x1], 1 }
 0x2d3   :  { %584 = vsyncpa [#allocation8], 1 }
 0x2d4   :  { %585 = vsyncpa [#allocation6], 1 }
 0x2d5   :  { %587 = vsyncpa [#allocation6 + $0x1], 1 }
 0x2d6   :  { %588 = vsyncpa [#allocation11], 1 }
 0x2d7   :  { %590 = vsyncpa [#allocation11 + $0x1], 1 }

</bundles_post_ra>
